<compile_context>
chip_gen: v7x
topology: tpu7x:2x2x1
jax: 0.10.0
libtpu: 0.0.40
codegen_flags: <defaults>
</compile_context>

<pallas_src>
import jax
import jax.numpy as jnp
from jax.experimental import pallas as pl
from jax.experimental.pallas import tpu as pltpu


def _round_up(x, m):
    return ((x + m - 1) // m) * m


def _vmem_capacity_bytes():
    """Physical VMEM capacity; conservative 64 MiB fallback if unqueryable."""
    try:
        info = pltpu.get_tpu_info()
        cap = getattr(info, "vmem_capacity_bytes", None)
        if cap:
            return int(cap)
    except Exception:
        pass
    return 64 * 1024 * 1024


def _num_tensorcores():
    """Best-effort TensorCores-per-chip query (v7x megacore); default 1."""
    try:
        info = pltpu.get_tpu_info()
        for attr in ("num_cores", "core_count", "num_tensorcores", "tensorcore_count"):
            v = getattr(info, attr, None)
            if isinstance(v, int) and v > 0:
                return v
    except Exception:
        pass
    try:
        d = jax.devices()[0]
        for attr in ("num_cores", "core_count"):
            v = getattr(d, attr, None)
            if isinstance(v, int) and v > 0:
                return v
    except Exception:
        pass
    return 1


def _h_tiling(H, th_target):
    """Hidden-dim tiling: (th, H_pad) with th == H_pad (single tile) or th a
    128-multiple dividing H_pad; H_pad >= H (padded rows contribute zeros)."""
    if H <= th_target:
        return H, H
    t = max(128, (th_target // 128) * 128)
    cand = t
    while cand >= 128:
        if H % cand == 0:
            return cand, H
        cand -= 128
    t_pad = max(128, min(t, 512))          # bound padding waste to < t_pad rows
    return t_pad, _round_up(H, t_pad)


def _pick_m_tile(M_sub, target, sub):
    """Largest token tile (multiple of sub, <= target), preferring a divisor of
    M_sub so the wrapper does not need to jnp.pad the whole activation."""
    target = max(sub, min(_round_up(target, sub), M_sub))
    t = (target // sub) * sub
    lo = max(sub, ((target // 2) // sub) * sub)
    while t >= lo:
        if M_sub % t == 0:
            return t
        t -= sub
    return (target // sub) * sub


def _vmem_estimate(tm, th, D, O, in_b, w_b, out_b, need_scratch):
    """Double-buffered tile footprint + f32 temporaries (g/x1/x2/hidden/dot)."""
    two_th = 2 * th
    interm = (5 * tm * th + tm * O) * 4
    return (2 * tm * D * in_b            # x tile
            + 2 * D * two_th * w_b       # fused w12 tile
            + 2 * two_th * 4             # b12 tile (f32)
            + 2 * th * O * w_b           # w3 tile
            + 2 * O * 4                  # b3 (f32)
            + 2 * tm * O * out_b         # output tile
            + (tm * O * 4 if need_scratch else 0)
            + interm)


def _swiglu_body(x_ref, w12_ref, b12_ref, w3_ref, b3_ref, acc_ref):
    # x_ref:   (tm, D)       token tile, compute dtype
    # w12_ref: (D, 2*th)     [ w1_tile.T | w2_tile.T ]  (MXU-native orientation)
    # b12_ref: (1, 2*th)     [ b1_tile   | b2_tile   ]  f32
    # w3_ref:  (th, O)       w3 tile, transposed to (H, O)
    # b3_ref:  (1, O)        f32
    # acc_ref: (tm, O)       f32 accumulator (scratch, or the output block itself)
    h = pl.program_id(1)

    @pl.when(h == 0)
    def _init():
        acc_ref[...] = jnp.broadcast_to(
            b3_ref[...].astype(acc_ref.dtype), acc_ref.shape)

    x = x_ref[...]
    # Fused gate matmul: one (tm, D) @ (D, 2*th) MXU op, f32 accumulation.
    g = jnp.dot(x, w12_ref[...], preferred_element_type=jnp.float32) + b12_ref[...]
    hdim = g.shape[-1] // 2
    x1 = g[:, :hdim]
    x2 = g[:, hdim:]
    hidden = (x1 * jax.nn.sigmoid(x1)) * x2          # SiLU(x1) * x2, f32
    acc_ref[...] += jnp.dot(hidden.astype(w3_ref.dtype), w3_ref[...],
                            preferred_element_type=jnp.float32)


def _swiglu_kernel_accum_out(x_ref, w12_ref, b12_ref, w3_ref, b3_ref, o_ref):
    # f32 output: accumulate directly into the resident output block.
    _swiglu_body(x_ref, w12_ref, b12_ref, w3_ref, b3_ref, o_ref)


def _swiglu_kernel_scratch(x_ref, w12_ref, b12_ref, w3_ref, b3_ref, o_ref, acc_ref):
    # Low-precision output: f32 scratch accumulator, cast on the last h step.
    _swiglu_body(x_ref, w12_ref, b12_ref, w3_ref, b3_ref, acc_ref)

    @pl.when(pl.program_id(1) == pl.num_programs(1) - 1)
    def _finalize():
        o_ref[...] = acc_ref[...].astype(o_ref.dtype)


def swiglu_ffn(x, w12, b12, w3, b3, *, tm=512, th=512, compute_dtype=jnp.bfloat16):
    """SwiGLU FFN forward.

    x: [..., D];  w12: [2H, D]; b12: [2H]; w3: [O, H]; b3: [O]
    (weights in torch nn.Linear [out, in] layout).  compute_dtype=None keeps
    x.dtype; default bf16 (f32 accumulation is always used on the MXU).
    """
    orig_shape = x.shape
    D = orig_shape[-1]
    out_dtype = x.dtype
    H = w12.shape[0] // 2
    O = w3.shape[0]

    if compute_dtype is None:
        compute_dtype = x.dtype
    compute_dtype = jnp.dtype(compute_dtype)

    x2d = x.reshape(-1, D).astype(compute_dtype)
    M = x2d.shape[0]

    in_b = compute_dtype.itemsize
    w_b = compute_dtype.itemsize
    out_b = jnp.dtype(out_dtype).itemsize
    sub = max(8, 32 // in_b)                  # sublane multiple for the token dim
    M_sub = _round_up(M, sub)

    need_scratch = jnp.dtype(out_dtype) != jnp.dtype(jnp.float32)

    # --- per-generation VMEM budget (v7x: 64 MiB physical; v5e/v6e: 128 MiB) ---
    cap = _vmem_capacity_bytes()
    fit_budget = int(0.70 * cap)              # tiles must fit here per estimate
    vmem_limit = int(0.85 * cap)              # scoped limit handed to Mosaic

    # --- tile selection ---
    th_eff, H_pad = _h_tiling(H, th)

    tm_target = max(sub, min(tm, M_sub))
    if _num_tensorcores() >= 2 and M_sub >= 2 * sub:
        # Guarantee >=2 M tiles so the "parallel" axis shards across both TCs.
        tm_target = min(tm_target, max(sub, ((M_sub // 2) // sub) * sub))
    tm_eff = _pick_m_tile(M_sub, tm_target, sub)

    # Shrink to fit VMEM: hidden tile first (does not reduce weight-stream
    # arithmetic intensity), then the token tile.
    for _ in range(32):
        if _vmem_estimate(tm_eff, th_eff, D, O, in_b, w_b, out_b,
                          need_scratch) <= fit_budget:
            break
        if th_eff > 256:
            th_eff, H_pad = _h_tiling(H, th_eff // 2)
        elif tm_eff > max(sub, 128):
            tm_eff = max(sub, ((tm_eff // 2) // sub) * sub)
        elif th_eff > 128:
            new_th, new_hp = _h_tiling(H, max(128, th_eff // 2))
            if new_th < th_eff:
                th_eff, H_pad = new_th, new_hp
            elif tm_eff > sub:
                tm_eff = max(sub, ((tm_eff // 2) // sub) * sub)
            else:
                break
        elif tm_eff > sub:
            tm_eff = max(sub, ((tm_eff // 2) // sub) * sub)
        else:
            break

    M_pad = _round_up(M_sub, tm_eff)
    if M_pad != M:
        x2d = jnp.pad(x2d, ((0, M_pad - M), (0, 0)))

    # --- one-time wrapper-side weight rearrangement (MXU-native, fused gates) ---
    Hn = H_pad // th_eff
    w12_3 = w12.reshape(2, H, D)
    b12_2 = b12.reshape(2, H)
    w3_t = w3.T                                           # (H, O)
    if H_pad != H:
        hp = H_pad - H
        w12_3 = jnp.pad(w12_3, ((0, 0), (0, hp), (0, 0)))
        b12_2 = jnp.pad(b12_2, ((0, 0), (0, hp)))
        w3_t = jnp.pad(w3_t, ((0, hp), (0, 0)))
    # w12p[h] = (D, 2*th) block [ w1_tile.T | w2_tile.T ]
    w12p = (w12_3.reshape(2, Hn, th_eff, D)
                 .transpose(1, 3, 0, 2)
                 .reshape(Hn, D, 2 * th_eff)
                 .astype(compute_dtype))
    b12p = (b12_2.reshape(2, Hn, th_eff)
                 .transpose(1, 0, 2)
                 .reshape(Hn, 1, 2 * th_eff)
                 .astype(jnp.float32))
    w3p = w3_t.astype(compute_dtype)                      # (H_pad, O)
    b3p = b3.reshape(1, O).astype(jnp.float32)

    grid = (M_pad // tm_eff, H_pad // th_eff)             # reduction axis last

    in_specs = [
        pl.BlockSpec((tm_eff, D), lambda i, h: (i, 0)),                    # x
        pl.BlockSpec((None, D, 2 * th_eff), lambda i, h: (h, 0, 0)),       # w12
        pl.BlockSpec((None, 1, 2 * th_eff), lambda i, h: (h, 0, 0)),       # b12
        pl.BlockSpec((th_eff, O), lambda i, h: (h, 0)),                    # w3
        pl.BlockSpec((1, O), lambda i, h: (0, 0)),                         # b3
    ]
    out_spec = pl.BlockSpec((tm_eff, O), lambda i, h: (i, 0))

    if need_scratch:
        kernel = _swiglu_kernel_scratch
        scratch_shapes = [pltpu.VMEM((tm_eff, O), jnp.float32)]
    else:
        kernel = _swiglu_kernel_accum_out
        scratch_shapes = []

    out2d = pl.pallas_call(
        kernel,
        out_shape=jax.ShapeDtypeStruct((M_pad, O), out_dtype),
        grid_spec=pltpu.PrefetchScalarGridSpec(
            num_scalar_prefetch=0,
            grid=grid,
            in_specs=in_specs,
            out_specs=out_spec,
            scratch_shapes=scratch_shapes,
        ),
        compiler_params=pltpu.CompilerParams(
            dimension_semantics=("parallel", "arbitrary"),
            vmem_limit_bytes=vmem_limit,
        ),
    )(x2d, w12p, b12p, w3p, b3p)

    out2d = out2d[:M]
    return out2d.reshape(*orig_shape[:-1], O)


def reference_swiglu(x, w12, b12, w3, b3):
    x12 = jnp.einsum("...d,hd->...h", x, w12) + b12
    H = w12.shape[0] // 2
    x1, x2 = x12[..., :H], x12[..., H:]
    return jnp.einsum("...h,oh->...o", jax.nn.silu(x1) * x2, w3) + b3


if __name__ == "__main__":
    key = jax.random.PRNGKey(0)
    B, S = 2, 8               # 16 tokens
    D = 32                    # in_features
    Hf = 32                   # hidden_features (defaults to in_features)
    Of = 32                   # out_features

    ks = jax.random.split(key, 8)
    x = jax.random.normal(ks[0], (B, S, D), dtype=jnp.float32)
    # Deterministic synthetic parameters (torch nn.Linear layout: [out, in]).
    w12 = jax.random.normal(ks[1], (2 * Hf, D), dtype=jnp.float32) * 0.05
    b12 = jax.random.normal(ks[2], (2 * Hf,), dtype=jnp.float32) * 0.05
    w3 = jax.random.normal(ks[3], (Of, Hf), dtype=jnp.float32) * 0.05
    b3 = jax.random.normal(ks[4], (Of,), dtype=jnp.float32) * 0.05

    ref = reference_swiglu(x, w12, b12, w3, b3)

    # 1) Default path: bf16 compute, f32 accumulation, f32 output (direct-acc).
    out = jax.block_until_ready(swiglu_ffn(x, w12, b12, w3, b3))
    assert out.shape == (B, S, Of) and out.dtype == jnp.float32
    assert jnp.allclose(out, ref, atol=1e-2, rtol=5e-2)

    # 2) Exact f32 compute path (tight tolerance).
    out_f32 = jax.block_until_ready(
        swiglu_ffn(x, w12, b12, w3, b3, compute_dtype=jnp.float32))
    assert jnp.allclose(out_f32, ref, atol=1e-5, rtol=1e-5)

    # 3) Ragged token count (M = 15): exercises the M padding path.
    x_r = jax.random.normal(ks[5], (3, 5, D), dtype=jnp.float32)
    out_r = jax.block_until_ready(
        swiglu_ffn(x_r, w12, b12, w3, b3, compute_dtype=jnp.float32))
    ref_r = reference_swiglu(x_r, w12, b12, w3, b3)
    assert out_r.shape == (3, 5, Of)
    assert jnp.allclose(out_r, ref_r, atol=1e-5, rtol=1e-5)

    # 4) bf16 activations/output: exercises the f32-scratch accumulator path.
    x_bf = x.astype(jnp.bfloat16)
    out_bf = jax.block_until_ready(swiglu_ffn(x_bf, w12, b12, w3, b3))
    ref_bf = reference_swiglu(x_bf.astype(jnp.float32), w12, b12, w3, b3)
    assert out_bf.dtype == jnp.bfloat16
    assert jnp.allclose(out_bf.astype(jnp.float32), ref_bf, atol=2e-2, rtol=5e-2)

    # 5) Multi-tile H with padding (H=320, th=128 -> H_pad=384, 3 h-steps).
    Hf2, Of2 = 320, 48
    w12b = jax.random.normal(ks[6], (2 * Hf2, D), dtype=jnp.float32) * 0.05
    b12b = jax.random.normal(ks[7], (2 * Hf2,), dtype=jnp.float32) * 0.05
    w3b = jax.random.normal(ks[5], (Of2, Hf2), dtype=jnp.float32) * 0.05
    b3b = jax.random.normal(ks[4], (Of2,), dtype=jnp.float32) * 0.05
    out_h = jax.block_until_ready(
        swiglu_ffn(x, w12b, b12b, w3b, b3b, th=128, compute_dtype=jnp.float32))
    ref_h = reference_swiglu(x, w12b, b12b, w3b, b3b)
    assert out_h.shape == (B, S, Of2)
    assert jnp.allclose(out_h, ref_h, atol=1e-5, rtol=1e-5)

    print("KERNEL_OK")
</pallas_src>

<mosaic_0001>
module attributes {stable_mosaic.version = 11 : i64} {
  func.func @_swiglu_kernel_accum_out(%arg0: i32, %arg1: i32, %arg2: memref<16x32xbf16, #tpu.memory_space<vmem>>, %arg3: memref<1x32x64xbf16, #tpu.memory_space<vmem>>, %arg4: memref<1x1x64xf32, #tpu.memory_space<vmem>>, %arg5: memref<32x32xbf16, #tpu.memory_space<vmem>>, %arg6: memref<1x32xf32, #tpu.memory_space<vmem>>, %arg7: memref<16x32xf32, #tpu.memory_space<vmem>>) attributes {dimension_semantics = [#tpu.dimension_semantics<parallel>, #tpu.dimension_semantics<arbitrary>], iteration_bounds = array<i64: 1, 1>, scalar_prefetch = 0 : i64, scratch_operands = 0 : i64, tpu.core_type = #tpu.core_type<tc>, window_params = [{transform_indices = @transform_0, window_bounds = array<i64: 16, 32>}, {transform_indices = @transform_1, window_bounds = array<i64: 1, 32, 64>}, {transform_indices = @transform_2, window_bounds = array<i64: 1, 1, 64>}, {transform_indices = @transform_3, window_bounds = array<i64: 32, 32>}, {pipeline_mode = #tpu.pipeline_mode<synchronous>, transform_indices = @transform_4, window_bounds = array<i64: 1, 32>}, {transform_indices = @transform_5, window_bounds = array<i64: 16, 32>}]} {
    %c0_i32 = arith.constant 0 : i32
    %0 = arith.cmpi eq, %arg1, %c0_i32 : i32
    %1 = arith.extui %0 : i1 to i32
    %c0_i32_0 = arith.constant 0 : i32
    %2 = arith.cmpi ne, %1, %c0_i32_0 : i32
    scf.if %2 {
      %c0_16 = arith.constant 0 : index
      %c0_17 = arith.constant 0 : index
      %26 = vector.load %arg6[%c0_16, %c0_17] : memref<1x32xf32, #tpu.memory_space<vmem>>, vector<1x32xf32>
      %27 = vector.shape_cast %26 : vector<1x32xf32> to vector<1x32xf32>
      %28 = vector.broadcast %27 : vector<1x32xf32> to vector<16x32xf32>
      %c0_18 = arith.constant 0 : index
      %c0_19 = arith.constant 0 : index
      %29 = vector.load %arg7[%c0_18, %c0_19] : memref<16x32xf32, #tpu.memory_space<vmem>>, vector<16x32xf32>
      tpu.vector_store %arg7[%c0_18, %c0_19], %28 {strides = array<i32>} : memref<16x32xf32, #tpu.memory_space<vmem>>, vector<16x32xf32>,
    } else {
    }
    %c0 = arith.constant 0 : index
    %c0_1 = arith.constant 0 : index
    %3 = vector.load %arg2[%c0, %c0_1] : memref<16x32xbf16, #tpu.memory_space<vmem>>, vector<16x32xbf16>
    %c0_2 = arith.constant 0 : index
    %c0_3 = arith.constant 0 : index
    %c0_4 = arith.constant 0 : index
    %4 = vector.load %arg3[%c0_2, %c0_3, %c0_4] : memref<1x32x64xbf16, #tpu.memory_space<vmem>>, vector<1x32x64xbf16>
    %5 = vector.shape_cast %4 : vector<1x32x64xbf16> to vector<32x64xbf16>
    %cst = arith.constant dense<0.000000e+00> : vector<16x64xf32>
    %6 = tpu.matmul %3, %5, %cst {dimension_numbers = #tpu.dot_dimension_numbers<[1], [0], [0], [1], [0, 0, 1, 1], [], []>} : vector<16x32xbf16>, vector<32x64xbf16>, vector<16x64xf32> -> vector<16x64xf32>
    %c0_5 = arith.constant 0 : index
    %c0_6 = arith.constant 0 : index
    %c0_7 = arith.constant 0 : index
    %7 = vector.load %arg4[%c0_5, %c0_6, %c0_7] : memref<1x1x64xf32, #tpu.memory_space<vmem>>, vector<1x1x64xf32>
    %8 = vector.shape_cast %7 : vector<1x1x64xf32> to vector<1x64xf32>
    %9 = vector.broadcast %8 : vector<1x64xf32> to vector<16x64xf32>
    %10 = arith.addf %6, %9 : vector<16x64xf32>
    %11 = vector.extract_strided_slice %10 {offsets = [0, 0], sizes = [16, 32], strides = [1, 1]} : vector<16x64xf32> to vector<16x32xf32>
    %12 = vector.extract_strided_slice %10 {offsets = [0, 32], sizes = [16, 32], strides = [1, 1]} : vector<16x64xf32> to vector<16x32xf32>
    %13 = arith.negf %11 : vector<16x32xf32>
    %14 = math.exp %13 : vector<16x32xf32>
    %cst_8 = arith.constant 1.000000e+00 : f32
    %15 = vector.broadcast %cst_8 : f32 to vector<16x32xf32>
    %16 = arith.addf %15, %14 : vector<16x32xf32>
    %17 = arith.divf %15, %16 : vector<16x32xf32>
    %18 = arith.mulf %11, %17 : vector<16x32xf32>
    %19 = arith.mulf %18, %12 : vector<16x32xf32>
    %c0_9 = arith.constant 0 : index
    %c0_10 = arith.constant 0 : index
    %20 = vector.load %arg7[%c0_9, %c0_10] : memref<16x32xf32, #tpu.memory_space<vmem>>, vector<16x32xf32>
    %21 = arith.truncf %19 : vector<16x32xf32> to vector<16x32xbf16>
    %c0_11 = arith.constant 0 : index
    %c0_12 = arith.constant 0 : index
    %22 = vector.load %arg5[%c0_11, %c0_12] : memref<32x32xbf16, #tpu.memory_space<vmem>>, vector<32x32xbf16>
    %cst_13 = arith.constant dense<0.000000e+00> : vector<16x32xf32>
    %23 = tpu.matmul %21, %22, %cst_13 {dimension_numbers = #tpu.dot_dimension_numbers<[1], [0], [0], [1], [0, 0, 1, 1], [], []>} : vector<16x32xbf16>, vector<32x32xbf16>, vector<16x32xf32> -> vector<16x32xf32>
    %24 = arith.addf %20, %23 : vector<16x32xf32>
    %c0_14 = arith.constant 0 : index
    %c0_15 = arith.constant 0 : index
    %25 = vector.load %arg7[%c0_14, %c0_15] : memref<16x32xf32, #tpu.memory_space<vmem>>, vector<16x32xf32>
    tpu.vector_store %arg7[%c0_14, %c0_15], %24 {strides = array<i32>} : memref<16x32xf32, #tpu.memory_space<vmem>>, vector<16x32xf32>,
    return
  }
  func.func @transform_0(%arg0: i32, %arg1: i32) -> (i32, i32) {
    %c0_i32 = arith.constant 0 : i32
    %c0_i32_0 = arith.constant 0 : i32
    return %arg0, %c0_i32 : i32, i32
  }
  func.func @transform_1(%arg0: i32, %arg1: i32) -> (i32, i32, i32) {
    %c0_i32 = arith.constant 0 : i32
    %c0_i32_0 = arith.constant 0 : i32
    %c0_i32_1 = arith.constant 0 : i32
    return %arg1, %c0_i32, %c0_i32_0 : i32, i32, i32
  }
  func.func @transform_2(%arg0: i32, %arg1: i32) -> (i32, i32, i32) {
    %c0_i32 = arith.constant 0 : i32
    %c0_i32_0 = arith.constant 0 : i32
    %c0_i32_1 = arith.constant 0 : i32
    return %arg1, %c0_i32, %c0_i32_0 : i32, i32, i32
  }
  func.func @transform_3(%arg0: i32, %arg1: i32) -> (i32, i32) {
    %c0_i32 = arith.constant 0 : i32
    %c0_i32_0 = arith.constant 0 : i32
    return %arg1, %c0_i32 : i32, i32
  }
  func.func @transform_4(%arg0: i32, %arg1: i32) -> (i32, i32) {
    %c0_i32 = arith.constant 0 : i32
    %c0_i32_0 = arith.constant 0 : i32
    %c0_i32_1 = arith.constant 0 : i32
    return %c0_i32, %c0_i32_0 : i32, i32
  }
  func.func @transform_5(%arg0: i32, %arg1: i32) -> (i32, i32) {
    %c0_i32 = arith.constant 0 : i32
    %c0_i32_0 = arith.constant 0 : i32
    return %arg0, %c0_i32 : i32, i32
  }
}

</mosaic_0001>

<bundles_post_ra>
// kernel: tpu_custom_call.1
= control target key start
LH: loop header
LB: loop body
LE: loop exit
PB: predicated region body
PF: predicated region fallthrough
CT: control target
= control target key end

     0   :  { %10 = vsyncpa [#allocation3], 0  ;;  %s529_s0 = inlined_call_operand.hbm [shape: bf16[16,32], index: 0, kind: input, shape index: {}]   ;;  %s530_s1 = inlined_call_operand.hbm [shape: bf16[1,32,64], index: 1, kind: input, shape index: {}]   ;;  %s531_s2 = inlined_call_operand.vmem [shape: f32[1,1,64], index: 2, kind: input, shape index: {}]   ;;  %s532_s3 = inlined_call_operand.hbm [shape: bf16[32,32], index: 3, kind: input, shape index: {}]   ;;  %s533_s4 = inlined_call_operand.vmem [shape: f32[1,32], index: 4, kind: input, shape index: {}]   ;;  %s534_s5 = inlined_call_operand.hbm [shape: f32[16,32], index: 5, kind: output, shape index: {}]  }
   0x1   :  { %11 = vsyncpa [#allocation6], 0 }
   0x2   :  { %12 = vsyncpa [#allocation4], 0  ;;  %s412_s18 = smov [#allocation5]   ;;  %s413_s20 = smov [#allocation2]  }
   0x3   :  { %s30_s19 = sshll.u32 %s412_s18, 4  ;;  %s18_s21 = sshll.u32 %s413_s20, 4  ;;  %s31_s19 = int_to_ptr.vmem [resolvable:$true] %s30_s19  ;;  %s453_s21 = int_to_ptr.vmem [resolvable:$true] %s18_s21 }
   0x4   :  { %s318_s24 = scalar_lea.hbm %s530_s1, 256 }
   0x5   :  { %p319_p0 = scmp.ne.s32.totalorder %s530_s1, %s318_s24  ;;  %p322_p1 = scmp.lt.u32.totalorder %s318_s24, %s530_s1 }
   0x7   :  { %p324_p2 = pnand %p322_p1, %p319_p0 }
   0x9   :  { %327 = shalt.err (!%p324_p2)
}
   0xa   :  { %s328_s29 = scalar_lea.vmem %s31_s19, 256  ;;  %p333_p4 = scmp.lt.s32.totalorder %s31_s19, %s31_s19 }
   0xb   :  { %p329_p3 = scmp.ne.s32.totalorder %s31_s19, %s328_s29  ;;  %p334_p5 = scmp.lt.s32.totalorder %s328_s29, %s328_s29 }
   0xd   :  { %p335_p6 = por %p334_p5, %p333_p4 }
   0xf   :  { %p336_p7 = pnand %p335_p6, %p329_p3 }
  0x11   :  { %339 = shalt.err (!%p336_p7)
}
  0x12   :  { %s414_s30 = smov 64   ;;  %s415_s6 = smov 4  }
  0x13   :  { %36 = dma.hbm_to_vmem [thread:$0]  %s530_s1, 256, %s31_s19, [#allocation6], %s414_s30, %s414_s30, %s415_s6  }
  0x14   :  { %s340_s11 = scalar_lea.hbm %s529_s0, 128 }
  0x15   :  { %p341_p8 = scmp.ne.s32.totalorder %s529_s0, %s340_s11  ;;  %p344_p9 = scmp.lt.u32.totalorder %s340_s11, %s529_s0 }
  0x17   :  { %p346_p10 = pnand %p344_p9, %p341_p8 }
  0x19   :  { %349 = shalt.err (!%p346_p10)
}
  0x1a   :  { %s350_s16 = scalar_lea.vmem %s453_s21, 128  ;;  %p355_p12 = scmp.lt.s32.totalorder %s453_s21, %s453_s21 }
  0x1b   :  { %p351_p11 = scmp.ne.s32.totalorder %s453_s21, %s350_s16  ;;  %p356_p13 = scmp.lt.s32.totalorder %s350_s16, %s350_s16 }
  0x1d   :  { %p357_p0 = por %p356_p13, %p355_p12 }
  0x1f   :  { %p358_p1 = pnand %p357_p0, %p351_p11 }
  0x21   :  { %361 = shalt.err (!%p358_p1)
}
  0x22   :  { %24 = dma.hbm_to_vmem [thread:$0]  %s529_s0, 128, %s453_s21, [#allocation3], %s414_s30, %s414_s30, %s415_s6  }
  0x23   :  { %s416_s18 = smov [#allocation7]   ;;  %s362_s23 = scalar_lea.hbm %s532_s3, 256 }
  0x24   :  { %s44_s19 = sshll.u32 %s416_s18, 4  ;;  %p363_p2 = scmp.ne.s32.totalorder %s532_s3, %s362_s23  ;;  %s45_s19 = int_to_ptr.vmem [resolvable:$true] %s44_s19 }
  0x25   :  { %p366_p3 = scmp.lt.u32.totalorder %s362_s23, %s532_s3 }
  0x27   :  { %p368_p4 = pnand %p366_p3, %p363_p2 }
  0x29   :  { %371 = shalt.err (!%p368_p4)
}
  0x2a   :  { %s372_s28 = scalar_lea.vmem %s45_s19, 256  ;;  %p377_p6 = scmp.lt.s32.totalorder %s45_s19, %s45_s19 }
  0x2b   :  { %p373_p5 = scmp.ne.s32.totalorder %s45_s19, %s372_s28  ;;  %p378_p7 = scmp.lt.s32.totalorder %s372_s28, %s372_s28 }
  0x2d   :  { %p379_p8 = por %p378_p7, %p377_p6 }
  0x2f   :  { %p380_p9 = pnand %p379_p8, %p373_p5 }
  0x31   :  { %383 = shalt.err (!%p380_p9)
}
  0x32   :  { %50 = dma.hbm_to_vmem [thread:$0]  %s532_s3, 256, %s45_s19, [#allocation6], %s414_s30, %s414_s30, %s415_s6  }
  0x33   :  { %406 = dma.done.wait [#allocation3], 128  }
  0x34   :  { %407 = vsyncadd [#allocation3], 4294967168 }
  0x35   :  { %408 = dma.done.wait [#allocation6], 512  }
  0x36   :  { %409 = vsyncadd [#allocation6], 4294966784  ;;  %v417_v0 = vmov 0.0   ;;  %vm418_vm0 = vmmov 0   ;;  %v305_v1 = vld [vmem:[#allocation5] sm:$0xff]   ;;  %v306_v2 = vld [vmem:[#allocation5 + $0x8] sm:$0xff]  }
  0x37   :  { %278 = vmatprep.subr.bf16.mxu0 %v417_v0  ;;  %282 = vmatprep.mubr.msk.bf16.mxu0 %vm418_vm0, %v417_v0  ;;  %v307_v3 = vld [vmem:[#allocation2] sm:$0xff]   ;;  %vm74_vm1 = vcmask 261120   ;;  %v308_v4 = vld [vmem:[#allocation7] sm:$0xff]   ;;  %s419_s7 = smov 96  }
  0x38   :  { %286 = vmatprep.subr.bf16.mxu1 %v417_v0  ;;  %290 = vmatprep.mubr.msk.bf16.mxu1 %vm418_vm0, %v417_v0  ;;  %v309_v5 = vld [vmem:[#allocation7 + $0x8] sm:$0xff]  }
  0x39   :  { %279 = vmatpush3.bf16.msra.mxu0 %v305_v1  ;;  %287 = vmatpush3.bf16.msra.mxu1 %v308_v4  ;;  %v262_v6 = vld [vmem:[%s531_s2] ss:$0 sm:$0xff]  ;;  %s420_s2 = smov [#allocation8]  }
  0x3a   :  { %280 = vmatprep.subr.bf16.mxu0 %v417_v0  ;;  %288 = vmatprep.subr.bf16.mxu1 %v417_v0  ;;  %v261_v7 = vld [vmem:[%s533_s4] ss:$0 sm:$0xff]  ;;  %s248_s4 = sshll.u32 %s420_s2, 4  ;;  %s249_s4 = int_to_ptr.vmem [resolvable:$true] %s248_s4 }
  0x3b   :  { %75 = vst.msk [vmem:[#allocation8] sm:$0xff] %vm74_vm1, %v261_v7  ;;  %76 = vst.msk [vmem:[#allocation8 + $0x8] sm:$0xff] %vm74_vm1, %v261_v7  ;;  %s384_s8 = scalar_lea.vmem %s249_s4, 256  ;;  %p389_p11 = scmp.lt.s32.totalorder %s249_s4, %s249_s4 }
  0x3c   :  { %p385_p10 = scmp.ne.s32.totalorder %s249_s4, %s384_s8  ;;  %p390_p12 = scmp.lt.s32.totalorder %s384_s8, %s384_s8 }
  0x3d   :  { %281 = vmatpush3.bf16.msra.mxu0 %v306_v2  ;;  %289 = vmatpush3.bf16.msra.mxu1 %v309_v5 }
  0x3e   :  { %p391_p13 = por %p390_p12, %p389_p11 }
  0x40   :  { %283 = vmatmul.mubr.msk.bf16.vlgmr.msra.gmra.mrb[0].mxu0 %vm74_vm1, %v307_v3  ;;  %p392_p0 = pnand %p391_p13, %p385_p10 }
  0x42   :  { %v176_v29 = vld [vmem:[#allocation8] sm:$0xff]  ;;  %v177_v31 = vld [vmem:[#allocation8 + $0x8] sm:$0xff] }
 0x113   :  { %v145_v8 = vpop.f32.mrb[0].mxu0 }
 0x114   :  { %v146_v9 = vadd.f32 %v262_v6, %v145_v8  ;;  %v284_v10 = vpop.f32.mrb[1].mxu0 }
 0x115   :  { %v148_v11 = vpop.f32.mrb[2].mxu0 }
 0x116   :  { %168 = vrot.lane.b32.xlu0 %v146_v9, %s419_s7  ;;  %v285_v12 = vpop.f32.mrb[3].mxu0  ;;  %v149_v13 = vadd.f32 %v262_v6, %v148_v11  ;;  %v267_v14 = vmul.f32 -1.442695, %v146_v9 }
 0x118   :  { %v268_v15 = vmul.f32 -1.442695, %v149_v13  ;;  %310 = vpow2.f32 %v267_v14 }
 0x11a   :  { %170 = vrot.lane.b32.xlu0 %v149_v13, %s419_s7  ;;  %312 = vpow2.f32 %v268_v15 }
 0x122   :  { %v311_v16 = vpop.eup %310 }
 0x123   :  { %v158_v18 = vadd.f32 1.0, %v311_v16 }
 0x124   :  { %v313_v17 = vpop.eup %312 }
 0x125   :  { %v159_v19 = vadd.f32 1.0, %v313_v17  ;;  %314 = vrcp.f32 %v158_v18 }
 0x127   :  { %316 = vrcp.f32 %v159_v19 }
 0x12f   :  { %v315_v20 = vpop.eup %314 }
 0x130   :  { %v164_v23 = vmul.f32 %v315_v20, %v146_v9 }
 0x131   :  { %v317_v21 = vpop.eup %316 }
 0x132   :  { %v165_v24 = vmul.f32 %v317_v21, %v149_v13 }
 0x188   :  { %v169_v22 = vpop.permute.xlu0 %168 }
 0x189   :  { %v174_v26 = vmul.f32 %v169_v22, %v164_v23 }
 0x18c   :  { %v171_v25 = vpop.permute.xlu0 %170 }
 0x18d   :  { %v175_v27 = vmul.f32 %v171_v25, %v165_v24 }
 0x18f   :  { %v178_v28 = vpack.c.bf16 %v175_v27, %v174_v26 }
 0x191   :  { %291 = vmatmul.mubr.msk.bf16.vlgmr.msra.gmra.mrb[0].mxu1 %vm74_vm1, %v178_v28 }
 0x264   :  { %v232_v30 = vpop.f32.mrb[0].mxu1 }
 0x265   :  { %v239_v32 = vadd.f32 %v232_v30, %v176_v29  ;;  %v292_v33 = vpop.f32.mrb[1].mxu1 }
 0x266   :  { %v235_v34 = vpop.f32.mrb[2].mxu1 }
 0x267   :  { %241 = vst.msk [vmem:[#allocation8] sm:$0xff] %vm74_vm1, %v239_v32  ;;  %v240_v35 = vadd.f32 %v235_v34, %v177_v31  ;;  %v293_v36 = vpop.f32.mrb[3].mxu1 }
 0x269   :  { %242 = vst.msk [vmem:[#allocation8 + $0x8] sm:$0xff] %vm74_vm1, %v240_v35 }
 0x26a   :  { %395 = shalt.err (!%p392_p0)
}
 0x26b   :  { %s396_s11 = scalar_lea.hbm %s534_s5, 256 }
 0x26c   :  { %p397_p1 = scmp.ne.s32.totalorder %s534_s5, %s396_s11  ;;  %p400_p2 = scmp.lt.u32.totalorder %s396_s11, %s534_s5 }
 0x26e   :  { %p402_p3 = pnand %p400_p2, %p397_p1 }
 0x270   :  { %405 = shalt.err (!%p402_p3)
}
 0x271   :  { %s421_s16 = smov 128   ;;  %s422_s1 = smov 8  }
 0x272   :  { %254 = dma.vmem_to_hbm [thread:$0]  %s249_s4, 256, %s534_s5, [#allocation4], %s421_s16, %s421_s16, %s422_s1  }
 0x273   :  { %410 = dma.done.wait [#allocation4], 256  }
 0x274   :  { %411 = vsyncadd [#allocation4], 4294967040 }
 0x275   :  { %258 = vsyncpa [#allocation3], 1 }
 0x276   :  { %259 = vsyncpa [#allocation6], 1 }
 0x277   :  { %260 = vsyncpa [#allocation4], 1 }

</bundles_post_ra>
